<compile_context>
chip_gen: v7x
topology: tpu7x:2x2x1
jax: 0.10.0
libtpu: 0.0.40
codegen_flags: <defaults>
</compile_context>

<pallas_src>
import functools

import jax
import jax.numpy as jnp
from jax.experimental import pallas as pl
from jax.experimental.pallas import tpu as pltpu

_KH = 16  # halo block rows (multiple of the bf16 sublane packing)


def _ffn_kernel(xl_ref, xc_ref, xr_ref, w1_ref, b1_ref, w2_ref, b2_ref,
                o_ref, xcol_ref, acc_ref, *, seq_len, h_chunk):
    """One (batch, seq-tile) step of conv1d(k=3)+ReLU -> conv1d(k=3)+ReLU.

    xl_ref : (1, KH, C)   x rows [l0-KH, l0)         (left halo block, clamped)
    xc_ref : (1, TL, C)   x rows [l0, l0+TL)         (this tile)
    xr_ref : (1, KH, C)   x rows [l0+TL, l0+TL+KH)   (right halo block, clamped)
    w1_ref : (3*C, H)     conv1 weights, im2col layout (w1_flat[t*C+c, h]), bf16
    b1_ref : (1, H)       conv1 bias, f32
    w2_ref : (3, H, C)    conv2 weights, tap-major, bf16
    b2_ref : (1, C)       conv2 bias, f32
    o_ref  : (1, TL, C)   output rows [l0, l0+TL)
    xcol_ref: VMEM scratch (TL+2, 3*C) bf16 — im2col window for conv1
    acc_ref : VMEM scratch (TL, C) f32    — conv2 accumulator
    """
    i = pl.program_id(1)
    n_l = pl.num_programs(1)
    tl = o_ref.shape[1]
    kh = xl_ref.shape[1]
    c_in = xc_ref.shape[2]
    c_out = o_ref.shape[2]
    hid = w1_ref.shape[1]
    cdt = xcol_ref.dtype

    # ---- im2col assembly: xcol[r, t*C:(t+1)*C] = x[l0 - 2 + r + t] ----------
    # Scratch row r corresponds to hidden row l0 - 1 + r (r in [0, TL+2)).
    xc = xc_ref[0]  # (TL, C), read once, stored three times (shifted)

    # tap 2: x rows [l0, l0+TL+2)
    xcol_ref[0:tl, 2 * c_in:3 * c_in] = xc

    @pl.when(i < n_l - 1)
    def _():
        xcol_ref[tl:tl + 2, 2 * c_in:3 * c_in] = xr_ref[0, 0:2, :]

    @pl.when(i == n_l - 1)
    def _():  # x[L] feeds the *valid* hidden row L-1 -> exact zero padding
        xcol_ref[tl:tl + 2, 2 * c_in:3 * c_in] = jnp.zeros((2, c_in), cdt)

    # tap 1: x rows [l0-1, l0+TL+1); both halo rows feed only masked hidden rows
    xcol_ref[0:1, c_in:2 * c_in] = xl_ref[0, kh - 1:kh, :]
    xcol_ref[1:tl + 1, c_in:2 * c_in] = xc
    xcol_ref[tl + 1:tl + 2, c_in:2 * c_in] = xr_ref[0, 0:1, :]

    # tap 0: x rows [l0-2, l0+TL)
    @pl.when(i > 0)
    def _():
        xcol_ref[0:2, 0:c_in] = xl_ref[0, kh - 2:kh, :]

    @pl.when(i == 0)
    def _():  # x[-1] feeds the *valid* hidden row 0 -> exact zero padding
        xcol_ref[0:2, 0:c_in] = jnp.zeros((2, c_in), cdt)

    xcol_ref[2:tl + 2, 0:c_in] = xc

    # Hidden rows outside [0, L) are conv2's zero padding: mask them after ReLU.
    row = jax.lax.broadcasted_iota(jnp.int32, (tl + 2, 1), 0) + (i * tl - 1)
    valid = (row >= 0) & (row < seq_len)

    # ---- conv1 + ReLU -> conv2, tiled over the hidden dimension -------------
    # Per chunk only a (TL+2, Hc) hidden block is live; conv2 accumulates into
    # the (TL, C) f32 VMEM scratch so register pressure stays bounded.
    for k, h0 in enumerate(range(0, hid, h_chunk)):
        hsz = min(h_chunk, hid - h0)
        h1 = jnp.dot(xcol_ref[...], w1_ref[:, h0:h0 + hsz],
                     preferred_element_type=jnp.float32)          # (TL+2, Hc)
        hw = jnp.maximum(h1 + b1_ref[:, h0:h0 + hsz], 0.0)
        hw = jnp.where(valid, hw, 0.0).astype(cdt)
        for t in range(3):  # kernel_size = 3, unrolled
            contrib = jnp.dot(hw[t:t + tl, :], w2_ref[t, h0:h0 + hsz, :],
                              preferred_element_type=jnp.float32)  # (TL, C)
            if k == 0 and t == 0:
                acc_ref[...] = contrib
            else:
                acc_ref[...] += contrib

    y = jnp.maximum(acc_ref[...] + b2_ref[...], 0.0)
    o_ref[0] = y.astype(o_ref.dtype)


@functools.partial(jax.jit,
                   static_argnames=("tile_l", "h_chunk", "compute_dtype",
                                    "out_dtype"))
def position_wise_ffn(x_ncl, w1, b1, w2, b2, *, tile_l=256, h_chunk=512,
                      compute_dtype=jnp.bfloat16, out_dtype=None):
    """x_ncl: (N, C, L) float32 — same layout as the PyTorch module.

    w1: (3, C, H)  (w1[t] == torch_conv1.weight[:, :, t].T), b1: (H,)
    w2: (3, H, C)  (w2[t] == torch_conv2.weight[:, :, t].T), b2: (C,)
    Returns (N, C, L) in out_dtype (default: x_ncl.dtype).
    """
    N, C, L = x_ncl.shape
    H = w1.shape[2]
    out_dtype = x_ncl.dtype if out_dtype is None else out_dtype

    tl = min(tile_l, L)
    assert tl % _KH == 0 and L % tl == 0, (
        "sequence length and tile must be multiples of %d" % _KH)
    n_l = L // tl
    blocks_per_tile = tl // _KH
    n_halo_blocks = L // _KH
    hc = min(h_chunk, H)

    # NCL -> NLC (+ bf16 cast) is the only wrapper pass over x; conv padding and
    # the im2col layout are handled in-kernel (no jnp.pad HBM pass).
    x_nlc = jnp.transpose(x_ncl, (0, 2, 1)).astype(compute_dtype)
    w1c = w1.reshape(3 * C, H).astype(compute_dtype)   # im2col weight layout
    w2c = w2.astype(compute_dtype)
    b1_2d = b1.reshape(1, H).astype(jnp.float32)
    b2_2d = b2.reshape(1, C).astype(jnp.float32)

    def left_map(n, i):   # block holding x rows [l0-KH, l0); clamped at i == 0
        return (n, jnp.maximum(i * blocks_per_tile - 1, 0), 0)

    def right_map(n, i):  # block holding x rows [l0+TL, l0+TL+KH); clamped at last
        return (n, jnp.minimum((i + 1) * blocks_per_tile, n_halo_blocks - 1), 0)

    kernel = functools.partial(_ffn_kernel, seq_len=L, h_chunk=hc)

    # Constant-index operands never re-DMA -> single-buffer them.
    const = pl.Buffered(1)

    # VMEM budget: actual resident buffers * 2 + headroom, capped at 75% of the
    # physical per-core VMEM (~48 MiB on v7x, ~96 MiB on v5e/v6e).
    bpe = jnp.dtype(compute_dtype).itemsize
    obpe = jnp.dtype(out_dtype).itemsize
    resident = (2 * tl * C * bpe                      # x centre tile (x2 buffers)
                + 2 * 2 * _KH * C * bpe               # halo blocks (x2 buffers)
                + 2 * tl * C * obpe                   # output tile (x2 buffers)
                + 6 * C * H * bpe                     # weights (single-buffered)
                + (H + C) * 4                         # biases
                + (tl + 2) * 3 * C * bpe              # im2col scratch
                + tl * C * 4)                         # f32 conv2 accumulator
    vmem_limit = max(2 * resident + (8 << 20), 32 << 20)
    try:
        phys_vmem = pltpu.get_tpu_info().vmem_capacity_bytes
    except Exception:
        phys_vmem = 128 << 20
    vmem_limit = int(min(vmem_limit, int(0.75 * phys_vmem)))

    cost = pl.CostEstimate(
        flops=12 * N * L * C * H,
        transcendentals=0,
        bytes_accessed=int(N * L * C * (bpe + obpe) + 6 * C * H * bpe
                           + (H + C) * 4))

    out_nlc = pl.pallas_call(
        kernel,
        out_shape=jax.ShapeDtypeStruct((N, L, C), out_dtype),
        grid_spec=pltpu.PrefetchScalarGridSpec(
            num_scalar_prefetch=0,
            grid=(N, n_l),
            in_specs=[
                pl.BlockSpec((1, _KH, C), left_map),
                pl.BlockSpec((1, tl, C), lambda n, i: (n, i, 0)),
                pl.BlockSpec((1, _KH, C), right_map),
                pl.BlockSpec((3 * C, H), lambda n, i: (0, 0),
                             pipeline_mode=const),
                pl.BlockSpec((1, H), lambda n, i: (0, 0), pipeline_mode=const),
                pl.BlockSpec((3, H, C), lambda n, i: (0, 0, 0),
                             pipeline_mode=const),
                pl.BlockSpec((1, C), lambda n, i: (0, 0), pipeline_mode=const),
            ],
            out_specs=pl.BlockSpec((1, tl, C), lambda n, i: (n, i, 0)),
            scratch_shapes=[pltpu.VMEM((tl + 2, 3 * C), compute_dtype),
                            pltpu.VMEM((tl, C), jnp.float32)],
        ),
        compiler_params=pltpu.CompilerParams(
            dimension_semantics=("parallel", "parallel"),
            vmem_limit_bytes=vmem_limit),
        cost_estimate=cost,
    )(x_nlc, x_nlc, x_nlc, w1c, b1_2d, w2c, b2_2d)

    # NLC -> NCL (disappears if the surrounding model stays NLC; see TODO above).
    return jnp.transpose(out_nlc, (0, 2, 1))


def _reference_ffn(x_ncl, w1, b1, w2, b2, *, compute_dtype=jnp.float32):
    """Pure-JAX/XLA reference using the same dtype strategy as the kernel."""
    N, C, L = x_ncl.shape
    x = jnp.transpose(x_ncl, (0, 2, 1)).astype(compute_dtype)
    xp = jnp.pad(x, ((0, 0), (1, 1), (0, 0)))
    w1c = w1.astype(compute_dtype)
    w2c = w2.astype(compute_dtype)
    h = sum(jnp.einsum('nlc,ch->nlh', xp[:, t:t + L, :], w1c[t],
                       preferred_element_type=jnp.float32)
            for t in range(3)) + b1
    h = jnp.maximum(h, 0.0)
    hp = jnp.pad(h.astype(compute_dtype), ((0, 0), (1, 1), (0, 0)))
    y = sum(jnp.einsum('nlh,hc->nlc', hp[:, t:t + L, :], w2c[t],
                       preferred_element_type=jnp.float32)
            for t in range(3)) + b2
    y = jnp.maximum(y, 0.0)
    return jnp.transpose(y, (0, 2, 1)).astype(x_ncl.dtype)


if __name__ == "__main__":
    # Small shapes consistent with the module: batch=2, channels=4, hidden=32.
    # L=32 with tile_l=16 -> two sequence tiles per batch element, so the
    # in-kernel halo handling between tiles is exercised; h_chunk=16 -> two
    # hidden chunks, so the hidden-dim tiling loop is exercised too.
    N, C, H, L = 2, 4, 32, 32
    TL = 16

    key = jax.random.PRNGKey(0)
    kx, k1, k2, k3, k4 = jax.random.split(key, 5)

    x = jax.random.normal(kx, (N, C, L), dtype=jnp.float32)

    # PyTorch Conv1d-style init: U(-1/sqrt(fan_in*k), +1/sqrt(fan_in*k)).
    bound1 = 1.0 / jnp.sqrt(jnp.float32(C * 3))
    bound2 = 1.0 / jnp.sqrt(jnp.float32(H * 3))
    w1 = jax.random.uniform(k1, (3, C, H), jnp.float32, -bound1, bound1)
    b1 = jax.random.uniform(k2, (H,), jnp.float32, -bound1, bound1)
    w2 = jax.random.uniform(k3, (3, H, C), jnp.float32, -bound2, bound2)
    b2 = jax.random.uniform(k4, (C,), jnp.float32, -bound2, bound2)

    out = position_wise_ffn(x, w1, b1, w2, b2, tile_l=TL, h_chunk=16)
    out = jax.block_until_ready(out)
    assert out.shape == (N, C, L)

    # Exact-strategy reference (bf16 operands, f32 accumulation).
    ref_bf16 = _reference_ffn(x, w1, b1, w2, b2, compute_dtype=jnp.bfloat16)
    assert jnp.allclose(out, ref_bf16, atol=5e-3, rtol=5e-3), \
        "mismatch vs bf16 reference"

    # Sanity check against the full-f32 reference (bf16 rounding tolerance).
    ref_f32 = _reference_ffn(x, w1, b1, w2, b2, compute_dtype=jnp.float32)
    assert jnp.allclose(out, ref_f32, atol=5e-2, rtol=5e-2), \
        "mismatch vs f32 reference"

    print("KERNEL_OK")
</pallas_src>

<mosaic_0001>
module attributes {stable_mosaic.version = 11 : i64} {
  func.func @_ffn_kernel(%arg0: i32, %arg1: i32, %arg2: memref<1x16x4xbf16, #tpu.memory_space<vmem>>, %arg3: memref<1x16x4xbf16, #tpu.memory_space<vmem>>, %arg4: memref<1x16x4xbf16, #tpu.memory_space<vmem>>, %arg5: memref<12x32xbf16, #tpu.memory_space<vmem>>, %arg6: memref<1x32xf32, #tpu.memory_space<vmem>>, %arg7: memref<3x32x4xbf16, #tpu.memory_space<vmem>>, %arg8: memref<1x4xf32, #tpu.memory_space<vmem>>, %arg9: memref<1x16x4xf32, #tpu.memory_space<vmem>>, %arg10: memref<18x12xbf16, #tpu.memory_space<vmem>>, %arg11: memref<16x4xf32, #tpu.memory_space<vmem>>) attributes {dimension_semantics = [#tpu.dimension_semantics<parallel>, #tpu.dimension_semantics<parallel>], iteration_bounds = array<i64: 2, 2>, scalar_prefetch = 0 : i64, scratch_operands = 2 : i64, tpu.core_type = #tpu.core_type<tc>, window_params = [{transform_indices = @transform_0, window_bounds = array<i64: 1, 16, 4>}, {transform_indices = @transform_1, window_bounds = array<i64: 1, 16, 4>}, {transform_indices = @transform_2, window_bounds = array<i64: 1, 16, 4>}, {pipeline_mode = #tpu.pipeline_mode<synchronous>, transform_indices = @transform_3, window_bounds = array<i64: 12, 32>}, {pipeline_mode = #tpu.pipeline_mode<synchronous>, transform_indices = @transform_4, window_bounds = array<i64: 1, 32>}, {pipeline_mode = #tpu.pipeline_mode<synchronous>, transform_indices = @transform_5, window_bounds = array<i64: 3, 32, 4>}, {pipeline_mode = #tpu.pipeline_mode<synchronous>, transform_indices = @transform_6, window_bounds = array<i64: 1, 4>}, {transform_indices = @transform_7, window_bounds = array<i64: 1, 16, 4>}]} {
    %c0 = arith.constant 0 : index
    %c0_0 = arith.constant 0 : index
    %c0_1 = arith.constant 0 : index
    %0 = vector.load %arg3[%c0, %c0_0, %c0_1] : memref<1x16x4xbf16, #tpu.memory_space<vmem>>, vector<1x16x4xbf16>
    %1 = vector.shape_cast %0 : vector<1x16x4xbf16> to vector<16x4xbf16>
    %c0_2 = arith.constant 0 : index
    %c8 = arith.constant 8 : index
    %2 = vector.load %arg10[%c0_2, %c8] : memref<18x12xbf16, #tpu.memory_space<vmem>>, vector<16x4xbf16>
    tpu.vector_store %arg10[%c0_2, %c8], %1 {strides = array<i32>} : memref<18x12xbf16, #tpu.memory_space<vmem>>, vector<16x4xbf16>,
    %c1_i32 = arith.constant 1 : i32
    %3 = arith.cmpi slt, %arg1, %c1_i32 : i32
    %4 = arith.extui %3 : i1 to i32
    %c0_i32 = arith.constant 0 : i32
    %5 = arith.cmpi ne, %4, %c0_i32 : i32
    scf.if %5 {
      %c0_90 = arith.constant 0 : index
      %c0_91 = arith.constant 0 : index
      %c0_92 = arith.constant 0 : index
      %108 = vector.load %arg4[%c0_90, %c0_91, %c0_92] : memref<1x16x4xbf16, #tpu.memory_space<vmem>>, vector<1x2x4xbf16>
      %109 = vector.shape_cast %108 : vector<1x2x4xbf16> to vector<2x4xbf16>
      %c16_93 = arith.constant 16 : index
      %c8_94 = arith.constant 8 : index
      %110 = vector.load %arg10[%c16_93, %c8_94] : memref<18x12xbf16, #tpu.memory_space<vmem>>, vector<2x4xbf16>
      tpu.vector_store %arg10[%c16_93, %c8_94], %109 {strides = array<i32>} : memref<18x12xbf16, #tpu.memory_space<vmem>>, vector<2x4xbf16>,
    } else {
    }
    %c1_i32_3 = arith.constant 1 : i32
    %6 = arith.cmpi eq, %arg1, %c1_i32_3 : i32
    %7 = arith.extui %6 : i1 to i32
    %c0_i32_4 = arith.constant 0 : i32
    %8 = arith.cmpi ne, %7, %c0_i32_4 : i32
    scf.if %8 {
      %cst_90 = arith.constant 0.000000e+00 : bf16
      %108 = vector.broadcast %cst_90 : bf16 to vector<2x4xbf16>
      %c16_91 = arith.constant 16 : index
      %c8_92 = arith.constant 8 : index
      %109 = vector.load %arg10[%c16_91, %c8_92] : memref<18x12xbf16, #tpu.memory_space<vmem>>, vector<2x4xbf16>
      tpu.vector_store %arg10[%c16_91, %c8_92], %108 {strides = array<i32>} : memref<18x12xbf16, #tpu.memory_space<vmem>>, vector<2x4xbf16>,
    } else {
    }
    %c0_5 = arith.constant 0 : index
    %c15 = arith.constant 15 : index
    %c0_6 = arith.constant 0 : index
    %9 = vector.load %arg2[%c0_5, %c15, %c0_6] : memref<1x16x4xbf16, #tpu.memory_space<vmem>>, vector<1x1x4xbf16>
    %10 = vector.shape_cast %9 : vector<1x1x4xbf16> to vector<1x4xbf16>
    %c0_7 = arith.constant 0 : index
    %c4 = arith.constant 4 : index
    %11 = vector.load %arg10[%c0_7, %c4] : memref<18x12xbf16, #tpu.memory_space<vmem>>, vector<1x4xbf16>
    tpu.vector_store %arg10[%c0_7, %c4], %10 {strides = array<i32>} : memref<18x12xbf16, #tpu.memory_space<vmem>>, vector<1x4xbf16>,
    %c1 = arith.constant 1 : index
    %c4_8 = arith.constant 4 : index
    %12 = vector.load %arg10[%c1, %c4_8] : memref<18x12xbf16, #tpu.memory_space<vmem>>, vector<16x4xbf16>
    tpu.vector_store %arg10[%c1, %c4_8], %1 {strides = array<i32>} : memref<18x12xbf16, #tpu.memory_space<vmem>>, vector<16x4xbf16>,
    %c0_9 = arith.constant 0 : index
    %c0_10 = arith.constant 0 : index
    %c0_11 = arith.constant 0 : index
    %13 = vector.load %arg4[%c0_9, %c0_10, %c0_11] : memref<1x16x4xbf16, #tpu.memory_space<vmem>>, vector<1x1x4xbf16>
    %14 = vector.shape_cast %13 : vector<1x1x4xbf16> to vector<1x4xbf16>
    %c17 = arith.constant 17 : index
    %c4_12 = arith.constant 4 : index
    %15 = vector.load %arg10[%c17, %c4_12] : memref<18x12xbf16, #tpu.memory_space<vmem>>, vector<1x4xbf16>
    tpu.vector_store %arg10[%c17, %c4_12], %14 {strides = array<i32>} : memref<18x12xbf16, #tpu.memory_space<vmem>>, vector<1x4xbf16>,
    %c0_i32_13 = arith.constant 0 : i32
    %16 = arith.cmpi sgt, %arg1, %c0_i32_13 : i32
    %17 = arith.extui %16 : i1 to i32
    %c0_i32_14 = arith.constant 0 : i32
    %18 = arith.cmpi ne, %17, %c0_i32_14 : i32
    scf.if %18 {
      %c0_90 = arith.constant 0 : index
      %c14 = arith.constant 14 : index
      %c0_91 = arith.constant 0 : index
      %108 = vector.load %arg2[%c0_90, %c14, %c0_91] : memref<1x16x4xbf16, #tpu.memory_space<vmem>>, vector<1x2x4xbf16>
      %109 = vector.shape_cast %108 : vector<1x2x4xbf16> to vector<2x4xbf16>
      %c0_92 = arith.constant 0 : index
      %c0_93 = arith.constant 0 : index
      %110 = vector.load %arg10[%c0_92, %c0_93] : memref<18x12xbf16, #tpu.memory_space<vmem>>, vector<2x4xbf16>
      tpu.vector_store %arg10[%c0_92, %c0_93], %109 {strides = array<i32>} : memref<18x12xbf16, #tpu.memory_space<vmem>>, vector<2x4xbf16>,
    } else {
    }
    %c0_i32_15 = arith.constant 0 : i32
    %19 = arith.cmpi eq, %arg1, %c0_i32_15 : i32
    %20 = arith.extui %19 : i1 to i32
    %c0_i32_16 = arith.constant 0 : i32
    %21 = arith.cmpi ne, %20, %c0_i32_16 : i32
    scf.if %21 {
      %cst_90 = arith.constant 0.000000e+00 : bf16
      %108 = vector.broadcast %cst_90 : bf16 to vector<2x4xbf16>
      %c0_91 = arith.constant 0 : index
      %c0_92 = arith.constant 0 : index
      %109 = vector.load %arg10[%c0_91, %c0_92] : memref<18x12xbf16, #tpu.memory_space<vmem>>, vector<2x4xbf16>
      tpu.vector_store %arg10[%c0_91, %c0_92], %108 {strides = array<i32>} : memref<18x12xbf16, #tpu.memory_space<vmem>>, vector<2x4xbf16>,
    } else {
    }
    %c2 = arith.constant 2 : index
    %c0_17 = arith.constant 0 : index
    %22 = vector.load %arg10[%c2, %c0_17] : memref<18x12xbf16, #tpu.memory_space<vmem>>, vector<16x4xbf16>
    tpu.vector_store %arg10[%c2, %c0_17], %1 {strides = array<i32>} : memref<18x12xbf16, #tpu.memory_space<vmem>>, vector<16x4xbf16>,
    %23 = tpu.iota {dimensions = array<i32: 0>} : vector<18x1xi32>
    %c16_i32 = arith.constant 16 : i32
    %24 = arith.muli %arg1, %c16_i32 : i32
    %c1_i32_18 = arith.constant 1 : i32
    %25 = arith.subi %24, %c1_i32_18 : i32
    %26 = vector.broadcast %25 : i32 to vector<18x1xi32>
    %27 = arith.addi %23, %26 : vector<18x1xi32>
    %c0_i32_19 = arith.constant 0 : i32
    %28 = vector.broadcast %c0_i32_19 : i32 to vector<18x1xi32>
    %29 = arith.cmpi sge, %27, %28 : vector<18x1xi32>
    %c32_i32 = arith.constant 32 : i32
    %30 = vector.broadcast %c32_i32 : i32 to vector<18x1xi32>
    %31 = arith.cmpi slt, %27, %30 : vector<18x1xi32>
    %32 = arith.andi %29, %31 : vector<18x1xi1>
    %c0_20 = arith.constant 0 : index
    %c0_21 = arith.constant 0 : index
    %33 = vector.load %arg10[%c0_20, %c0_21] : memref<18x12xbf16, #tpu.memory_space<vmem>>, vector<18x12xbf16>
    %c0_22 = arith.constant 0 : index
    %c0_23 = arith.constant 0 : index
    %34 = vector.load %arg5[%c0_22, %c0_23] : memref<12x32xbf16, #tpu.memory_space<vmem>>, vector<12x16xbf16>
    %cst = arith.constant dense<0.000000e+00> : vector<18x16xf32>
    %35 = tpu.matmul %33, %34, %cst {dimension_numbers = #tpu.dot_dimension_numbers<[1], [0], [0], [1], [0, 0, 1, 1], [], []>} : vector<18x12xbf16>, vector<12x16xbf16>, vector<18x16xf32> -> vector<18x16xf32>
    %c0_24 = arith.constant 0 : index
    %c0_25 = arith.constant 0 : index
    %36 = vector.load %arg6[%c0_24, %c0_25] : memref<1x32xf32, #tpu.memory_space<vmem>>, vector<1x16xf32>
    %37 = vector.broadcast %36 : vector<1x16xf32> to vector<18x16xf32>
    %38 = arith.addf %35, %37 : vector<18x16xf32>
    %cst_26 = arith.constant 0.000000e+00 : f32
    %39 = vector.broadcast %cst_26 : f32 to vector<18x16xf32>
    %40 = arith.maximumf %38, %39 : vector<18x16xf32>
    %cst_27 = arith.constant 0.000000e+00 : f32
    %41 = vector.shape_cast %32 : vector<18x1xi1> to vector<18x1xi1>
    %42 = vector.broadcast %41 : vector<18x1xi1> to vector<18x16xi1>
    %43 = vector.broadcast %cst_27 : f32 to vector<18x16xf32>
    %44 = arith.select %42, %40, %43 : vector<18x16xi1>, vector<18x16xf32>
    %45 = arith.truncf %44 : vector<18x16xf32> to vector<18x16xbf16>
    %46 = vector.extract_strided_slice %45 {offsets = [0, 0], sizes = [16, 16], strides = [1, 1]} : vector<18x16xbf16> to vector<16x16xbf16>
    %c0_28 = arith.constant 0 : index
    %c0_29 = arith.constant 0 : index
    %c0_30 = arith.constant 0 : index
    %47 = vector.load %arg7[%c0_28, %c0_29, %c0_30] : memref<3x32x4xbf16, #tpu.memory_space<vmem>>, vector<1x16x4xbf16>
    %48 = vector.shape_cast %47 : vector<1x16x4xbf16> to vector<16x4xbf16>
    %cst_31 = arith.constant dense<0.000000e+00> : vector<16x4xf32>
    %49 = tpu.matmul %46, %48, %cst_31 {dimension_numbers = #tpu.dot_dimension_numbers<[1], [0], [0], [1], [0, 0, 1, 1], [], []>} : vector<16x16xbf16>, vector<16x4xbf16>, vector<16x4xf32> -> vector<16x4xf32>
    %c0_32 = arith.constant 0 : index
    %c0_33 = arith.constant 0 : index
    %50 = vector.load %arg11[%c0_32, %c0_33] : memref<16x4xf32, #tpu.memory_space<vmem>>, vector<16x4xf32>
    tpu.vector_store %arg11[%c0_32, %c0_33], %49 {strides = array<i32>} : memref<16x4xf32, #tpu.memory_space<vmem>>, vector<16x4xf32>,
    %51 = vector.extract_strided_slice %45 {offsets = [1, 0], sizes = [16, 16], strides = [1, 1]} : vector<18x16xbf16> to vector<16x16xbf16>
    %c1_34 = arith.constant 1 : index
    %c0_35 = arith.constant 0 : index
    %c0_36 = arith.constant 0 : index
    %52 = vector.load %arg7[%c1_34, %c0_35, %c0_36] : memref<3x32x4xbf16, #tpu.memory_space<vmem>>, vector<1x16x4xbf16>
    %53 = vector.shape_cast %52 : vector<1x16x4xbf16> to vector<16x4xbf16>
    %cst_37 = arith.constant dense<0.000000e+00> : vector<16x4xf32>
    %54 = tpu.matmul %51, %53, %cst_37 {dimension_numbers = #tpu.dot_dimension_numbers<[1], [0], [0], [1], [0, 0, 1, 1], [], []>} : vector<16x16xbf16>, vector<16x4xbf16>, vector<16x4xf32> -> vector<16x4xf32>
    %c0_38 = arith.constant 0 : index
    %c0_39 = arith.constant 0 : index
    %55 = vector.load %arg11[%c0_38, %c0_39] : memref<16x4xf32, #tpu.memory_space<vmem>>, vector<16x4xf32>
    %56 = arith.addf %55, %54 : vector<16x4xf32>
    %c0_40 = arith.constant 0 : index
    %c0_41 = arith.constant 0 : index
    %57 = vector.load %arg11[%c0_40, %c0_41] : memref<16x4xf32, #tpu.memory_space<vmem>>, vector<16x4xf32>
    tpu.vector_store %arg11[%c0_40, %c0_41], %56 {strides = array<i32>} : memref<16x4xf32, #tpu.memory_space<vmem>>, vector<16x4xf32>,
    %58 = vector.extract_strided_slice %45 {offsets = [2, 0], sizes = [16, 16], strides = [1, 1]} : vector<18x16xbf16> to vector<16x16xbf16>
    %c2_42 = arith.constant 2 : index
    %c0_43 = arith.constant 0 : index
    %c0_44 = arith.constant 0 : index
    %59 = vector.load %arg7[%c2_42, %c0_43, %c0_44] : memref<3x32x4xbf16, #tpu.memory_space<vmem>>, vector<1x16x4xbf16>
    %60 = vector.shape_cast %59 : vector<1x16x4xbf16> to vector<16x4xbf16>
    %cst_45 = arith.constant dense<0.000000e+00> : vector<16x4xf32>
    %61 = tpu.matmul %58, %60, %cst_45 {dimension_numbers = #tpu.dot_dimension_numbers<[1], [0], [0], [1], [0, 0, 1, 1], [], []>} : vector<16x16xbf16>, vector<16x4xbf16>, vector<16x4xf32> -> vector<16x4xf32>
    %c0_46 = arith.constant 0 : index
    %c0_47 = arith.constant 0 : index
    %62 = vector.load %arg11[%c0_46, %c0_47] : memref<16x4xf32, #tpu.memory_space<vmem>>, vector<16x4xf32>
    %63 = arith.addf %62, %61 : vector<16x4xf32>
    %c0_48 = arith.constant 0 : index
    %c0_49 = arith.constant 0 : index
    %64 = vector.load %arg11[%c0_48, %c0_49] : memref<16x4xf32, #tpu.memory_space<vmem>>, vector<16x4xf32>
    tpu.vector_store %arg11[%c0_48, %c0_49], %63 {strides = array<i32>} : memref<16x4xf32, #tpu.memory_space<vmem>>, vector<16x4xf32>,
    %c0_50 = arith.constant 0 : index
    %c0_51 = arith.constant 0 : index
    %65 = vector.load %arg10[%c0_50, %c0_51] : memref<18x12xbf16, #tpu.memory_space<vmem>>, vector<18x12xbf16>
    %c0_52 = arith.constant 0 : index
    %c16 = arith.constant 16 : index
    %66 = vector.load %arg5[%c0_52, %c16] : memref<12x32xbf16, #tpu.memory_space<vmem>>, vector<12x16xbf16>
    %cst_53 = arith.constant dense<0.000000e+00> : vector<18x16xf32>
    %67 = tpu.matmul %65, %66, %cst_53 {dimension_numbers = #tpu.dot_dimension_numbers<[1], [0], [0], [1], [0, 0, 1, 1], [], []>} : vector<18x12xbf16>, vector<12x16xbf16>, vector<18x16xf32> -> vector<18x16xf32>
    %c0_54 = arith.constant 0 : index
    %c16_55 = arith.constant 16 : index
    %68 = vector.load %arg6[%c0_54, %c16_55] : memref<1x32xf32, #tpu.memory_space<vmem>>, vector<1x16xf32>
    %69 = vector.broadcast %68 : vector<1x16xf32> to vector<18x16xf32>
    %70 = arith.addf %67, %69 : vector<18x16xf32>
    %cst_56 = arith.constant 0.000000e+00 : f32
    %71 = vector.broadcast %cst_56 : f32 to vector<18x16xf32>
    %72 = arith.maximumf %70, %71 : vector<18x16xf32>
    %cst_57 = arith.constant 0.000000e+00 : f32
    %73 = vector.shape_cast %32 : vector<18x1xi1> to vector<18x1xi1>
    %74 = vector.broadcast %73 : vector<18x1xi1> to vector<18x16xi1>
    %75 = vector.broadcast %cst_57 : f32 to vector<18x16xf32>
    %76 = arith.select %74, %72, %75 : vector<18x16xi1>, vector<18x16xf32>
    %77 = arith.truncf %76 : vector<18x16xf32> to vector<18x16xbf16>
    %78 = vector.extract_strided_slice %77 {offsets = [0, 0], sizes = [16, 16], strides = [1, 1]} : vector<18x16xbf16> to vector<16x16xbf16>
    %c0_58 = arith.constant 0 : index
    %c16_59 = arith.constant 16 : index
    %c0_60 = arith.constant 0 : index
    %79 = vector.load %arg7[%c0_58, %c16_59, %c0_60] : memref<3x32x4xbf16, #tpu.memory_space<vmem>>, vector<1x16x4xbf16>
    %80 = vector.shape_cast %79 : vector<1x16x4xbf16> to vector<16x4xbf16>
    %cst_61 = arith.constant dense<0.000000e+00> : vector<16x4xf32>
    %81 = tpu.matmul %78, %80, %cst_61 {dimension_numbers = #tpu.dot_dimension_numbers<[1], [0], [0], [1], [0, 0, 1, 1], [], []>} : vector<16x16xbf16>, vector<16x4xbf16>, vector<16x4xf32> -> vector<16x4xf32>
    %c0_62 = arith.constant 0 : index
    %c0_63 = arith.constant 0 : index
    %82 = vector.load %arg11[%c0_62, %c0_63] : memref<16x4xf32, #tpu.memory_space<vmem>>, vector<16x4xf32>
    %83 = arith.addf %82, %81 : vector<16x4xf32>
    %c0_64 = arith.constant 0 : index
    %c0_65 = arith.constant 0 : index
    %84 = vector.load %arg11[%c0_64, %c0_65] : memref<16x4xf32, #tpu.memory_space<vmem>>, vector<16x4xf32>
    tpu.vector_store %arg11[%c0_64, %c0_65], %83 {strides = array<i32>} : memref<16x4xf32, #tpu.memory_space<vmem>>, vector<16x4xf32>,
    %85 = vector.extract_strided_slice %77 {offsets = [1, 0], sizes = [16, 16], strides = [1, 1]} : vector<18x16xbf16> to vector<16x16xbf16>
    %c1_66 = arith.constant 1 : index
    %c16_67 = arith.constant 16 : index
    %c0_68 = arith.constant 0 : index
    %86 = vector.load %arg7[%c1_66, %c16_67, %c0_68] : memref<3x32x4xbf16, #tpu.memory_space<vmem>>, vector<1x16x4xbf16>
    %87 = vector.shape_cast %86 : vector<1x16x4xbf16> to vector<16x4xbf16>
    %cst_69 = arith.constant dense<0.000000e+00> : vector<16x4xf32>
    %88 = tpu.matmul %85, %87, %cst_69 {dimension_numbers = #tpu.dot_dimension_numbers<[1], [0], [0], [1], [0, 0, 1, 1], [], []>} : vector<16x16xbf16>, vector<16x4xbf16>, vector<16x4xf32> -> vector<16x4xf32>
    %c0_70 = arith.constant 0 : index
    %c0_71 = arith.constant 0 : index
    %89 = vector.load %arg11[%c0_70, %c0_71] : memref<16x4xf32, #tpu.memory_space<vmem>>, vector<16x4xf32>
    %90 = arith.addf %89, %88 : vector<16x4xf32>
    %c0_72 = arith.constant 0 : index
    %c0_73 = arith.constant 0 : index
    %91 = vector.load %arg11[%c0_72, %c0_73] : memref<16x4xf32, #tpu.memory_space<vmem>>, vector<16x4xf32>
    tpu.vector_store %arg11[%c0_72, %c0_73], %90 {strides = array<i32>} : memref<16x4xf32, #tpu.memory_space<vmem>>, vector<16x4xf32>,
    %92 = vector.extract_strided_slice %77 {offsets = [2, 0], sizes = [16, 16], strides = [1, 1]} : vector<18x16xbf16> to vector<16x16xbf16>
    %c2_74 = arith.constant 2 : index
    %c16_75 = arith.constant 16 : index
    %c0_76 = arith.constant 0 : index
    %93 = vector.load %arg7[%c2_74, %c16_75, %c0_76] : memref<3x32x4xbf16, #tpu.memory_space<vmem>>, vector<1x16x4xbf16>
    %94 = vector.shape_cast %93 : vector<1x16x4xbf16> to vector<16x4xbf16>
    %cst_77 = arith.constant dense<0.000000e+00> : vector<16x4xf32>
    %95 = tpu.matmul %92, %94, %cst_77 {dimension_numbers = #tpu.dot_dimension_numbers<[1], [0], [0], [1], [0, 0, 1, 1], [], []>} : vector<16x16xbf16>, vector<16x4xbf16>, vector<16x4xf32> -> vector<16x4xf32>
    %c0_78 = arith.constant 0 : index
    %c0_79 = arith.constant 0 : index
    %96 = vector.load %arg11[%c0_78, %c0_79] : memref<16x4xf32, #tpu.memory_space<vmem>>, vector<16x4xf32>
    %97 = arith.addf %96, %95 : vector<16x4xf32>
    %c0_80 = arith.constant 0 : index
    %c0_81 = arith.constant 0 : index
    %98 = vector.load %arg11[%c0_80, %c0_81] : memref<16x4xf32, #tpu.memory_space<vmem>>, vector<16x4xf32>
    tpu.vector_store %arg11[%c0_80, %c0_81], %97 {strides = array<i32>} : memref<16x4xf32, #tpu.memory_space<vmem>>, vector<16x4xf32>,
    %c0_82 = arith.constant 0 : index
    %c0_83 = arith.constant 0 : index
    %99 = vector.load %arg11[%c0_82, %c0_83] : memref<16x4xf32, #tpu.memory_space<vmem>>, vector<16x4xf32>
    %c0_84 = arith.constant 0 : index
    %c0_85 = arith.constant 0 : index
    %100 = vector.load %arg8[%c0_84, %c0_85] : memref<1x4xf32, #tpu.memory_space<vmem>>, vector<1x4xf32>
    %101 = vector.broadcast %100 : vector<1x4xf32> to vector<16x4xf32>
    %102 = arith.addf %99, %101 : vector<16x4xf32>
    %cst_86 = arith.constant 0.000000e+00 : f32
    %103 = vector.broadcast %cst_86 : f32 to vector<16x4xf32>
    %104 = arith.maximumf %102, %103 : vector<16x4xf32>
    %c0_87 = arith.constant 0 : index
    %c0_88 = arith.constant 0 : index
    %c0_89 = arith.constant 0 : index
    %105 = vector.load %arg9[%c0_87, %c0_88, %c0_89] : memref<1x16x4xf32, #tpu.memory_space<vmem>>, vector<1x16x4xf32>
    %106 = vector.shape_cast %105 : vector<1x16x4xf32> to vector<16x4xf32>
    %107 = vector.shape_cast %104 : vector<16x4xf32> to vector<1x16x4xf32>
    tpu.vector_store %arg9[%c0_87, %c0_88, %c0_89], %107 {strides = array<i32>} : memref<1x16x4xf32, #tpu.memory_space<vmem>>, vector<1x16x4xf32>,
    return
  }
  func.func @transform_0(%arg0: i32, %arg1: i32) -> (i32, i32, i32) {
    %c1_i32 = arith.constant 1 : i32
    %0 = arith.muli %arg1, %c1_i32 : i32
    %c1_i32_0 = arith.constant 1 : i32
    %1 = arith.subi %0, %c1_i32_0 : i32
    %c0_i32 = arith.constant 0 : i32
    %2 = arith.maxsi %1, %c0_i32 : i32
    %c0_i32_1 = arith.constant 0 : i32
    %c0_i32_2 = arith.constant 0 : i32
    return %arg0, %2, %c0_i32_1 : i32, i32, i32
  }
  func.func @transform_1(%arg0: i32, %arg1: i32) -> (i32, i32, i32) {
    %c0_i32 = arith.constant 0 : i32
    %c0_i32_0 = arith.constant 0 : i32
    return %arg0, %arg1, %c0_i32 : i32, i32, i32
  }
  func.func @transform_2(%arg0: i32, %arg1: i32) -> (i32, i32, i32) {
    %c1_i32 = arith.constant 1 : i32
    %0 = arith.addi %arg1, %c1_i32 : i32
    %c1_i32_0 = arith.constant 1 : i32
    %1 = arith.muli %0, %c1_i32_0 : i32
    %c1_i32_1 = arith.constant 1 : i32
    %2 = arith.minsi %1, %c1_i32_1 : i32
    %c0_i32 = arith.constant 0 : i32
    %c0_i32_2 = arith.constant 0 : i32
    return %arg0, %2, %c0_i32 : i32, i32, i32
  }
  func.func @transform_3(%arg0: i32, %arg1: i32) -> (i32, i32) {
    %c0_i32 = arith.constant 0 : i32
    %c0_i32_0 = arith.constant 0 : i32
    %c0_i32_1 = arith.constant 0 : i32
    return %c0_i32, %c0_i32_0 : i32, i32
  }
  func.func @transform_4(%arg0: i32, %arg1: i32) -> (i32, i32) {
    %c0_i32 = arith.constant 0 : i32
    %c0_i32_0 = arith.constant 0 : i32
    %c0_i32_1 = arith.constant 0 : i32
    return %c0_i32, %c0_i32_0 : i32, i32
  }
  func.func @transform_5(%arg0: i32, %arg1: i32) -> (i32, i32, i32) {
    %c0_i32 = arith.constant 0 : i32
    %c0_i32_0 = arith.constant 0 : i32
    %c0_i32_1 = arith.constant 0 : i32
    %c0_i32_2 = arith.constant 0 : i32
    return %c0_i32, %c0_i32_0, %c0_i32_1 : i32, i32, i32
  }
  func.func @transform_6(%arg0: i32, %arg1: i32) -> (i32, i32) {
    %c0_i32 = arith.constant 0 : i32
    %c0_i32_0 = arith.constant 0 : i32
    %c0_i32_1 = arith.constant 0 : i32
    return %c0_i32, %c0_i32_0 : i32, i32
  }
  func.func @transform_7(%arg0: i32, %arg1: i32) -> (i32, i32, i32) {
    %c0_i32 = arith.constant 0 : i32
    %c0_i32_0 = arith.constant 0 : i32
    return %arg0, %arg1, %c0_i32 : i32, i32, i32
  }
}

</mosaic_0001>

<bundles_post_ra>
// kernel: position_wise_ffn.1
= control target key start
LH: loop header
LB: loop body
LE: loop exit
PB: predicated region body
PF: predicated region fallthrough
CT: control target
= control target key end

     0   :  { %s1575_s24 = smov 0   ;;  %s1577_s25 = smov 0   ;;  %s1774_s0 = inlined_call_operand.vmem [shape: bf16[2,32,4], index: 0, kind: input, shape index: {}, may-alias: {0,1,2}]   ;;  %s1775_s1 = inlined_call_operand.vmem [shape: bf16[2,32,4], index: 1, kind: input, shape index: {}, may-alias: {0,1,2}]   ;;  %s1776_s2 = inlined_call_operand.vmem [shape: bf16[2,32,4], index: 2, kind: input, shape index: {}, may-alias: {0,1,2}]   ;;  %s1777_s3 = inlined_call_operand.vmem [shape: bf16[12,32], index: 3, kind: input, shape index: {}]   ;;  %s1778_s4 = inlined_call_operand.vmem [shape: f32[1,32], index: 4, kind: input, shape index: {}]   ;;  %s1779_s5 = inlined_call_operand.vmem [shape: bf16[3,32,4], index: 5, kind: input, shape index: {}]   ;;  %s1780_s6 = inlined_call_operand.vmem [shape: f32[1,4], index: 6, kind: input, shape index: {}]   ;;  %s1781_s7 = inlined_call_operand.vmem [shape: f32[2,32,4], index: 7, kind: output, shape index: {}]  }
   0x1   :  { %s1579_s26 = smov 0   ;;  %s1581_s27 = smov 0  }
   0x2   :  { %s1583_s28 = smov 0  }
   0x3 LB: > { %s26_s29 = sadd.s32 1, %s1517_s26  ;;  %s29_s30 = sadd.s32 1, %s1521_s27  ;;  %s1525_s28 = sphi %s1583_s28, %s17_s28   ;;  %s1521_s27 = sphi %s1581_s27, %s1791_s27   ;;  %s1517_s26 = sphi %s1579_s26, %s1790_s26   ;;  %s1513_s25 = sphi %s1577_s25, %s1789_s25   ;;  %s1509_s24 = sphi %s1575_s24, %s1788_s24  }
   0x4   : > { %p27_p0 = scmp.ge.s32.totalorder %s26_s29, 2  ;;  %p1302_p1 = scmp.ge.s32.totalorder %s1525_s28, 1 }
   0x5   : > { %p316_p2 = scmp.lt.s32.totalorder %s1525_s28, 5 }
   0x6   : > { %s1793_s29 = smov (%p27_p0, %s26_s29), 0  ;;  %s1795_s30 = smov (!%p27_p0, %s29_s30), %s1521_s27 }
   0x7   : > { %p317_p3 = pnand %p1302_p1, %p316_p2  ;;  %p31_p4 = scmp.ge.s32.totalorder %s1795_s30, 2 }
   0x8   : > { %p384_p5 = scmp.lt.s32.totalorder (!%p317_p3), %s1513_s25, 1  ;;  %s1307_s8 = sshll.u32 (!%p317_p3), %s1509_s24, 1  ;;  %vm443_vm0 = vcmask (!%p317_p3), 93248  }
   0x9   : > { %s1797_s30 = smov (%p31_p4, %s1795_s30), 0  ;;  %320 = sbr.rel (%p317_p3) target bundleno = 1021 (0x3fd), region = 48 }
   0xa   : > { %p399_p6 = scmp.lt.s32.totalorder (!%p317_p3), %s1307_s8, 3  ;;  %s406_s9 = sadd.s32 (!%p317_p3), 1, %s1509_s24 }
   0xb   : > { %p407_p7 = scmp.lt.s32.totalorder (!%p317_p3), %s406_s9, 1  ;;  %s1527_s20 = smov (!%p317_p3), 8  }
   0xc   : > { %s1303_s21 = sadd.s32 (!%p317_p3), 4294967295, %s1509_s24  ;;  %p1316_p11 = scmp.ge.s32.totalorder (!%p317_p3), %s1509_s24, 1 }
   0xd   : > { %p381_p8 = scmp.gt.s32.totalorder (!%p317_p3), %s1303_s21, 0 }
  0x10   : > { %s1799_s25 = smov (!%p384_p5, %s1513_s25), 1  ;;  %s1801_s8 = smov (!%p399_p6, %s1307_s8), 3 }
  0x11   : > { %s1305_s10 = sshll.u32 %s1799_s25, 2  ;;  %s1803_s9 = smov (!%p407_p7, %s406_s9), 1  ;;  %vm455_vm1 = vcmask (!%p1316_p11), 90176  }
  0x12   : > { %s402_s11 = sadd.s32 %s1305_s10, %s1801_s8  ;;  %s1310_s22 = sshll.u32 %s1803_s9, 1 }
  0x13   : > { %s1309_s12 = sshll.u32 %s402_s11, 2  ;;  %s1315_s13 = sshll.u32 %s402_s11, 3 }
  0x14   : > { %s404_s16 = scalar_lea.vmem %s1775_s1, %s1309_s12  ;;  %s1615_s19 = scalar_lea.vmem %s1781_s7, %s1315_s13 }
  0x15   : > { %v1617_v0 = vld [vmem:[%s404_s16] sm:$0xf]  ;;  %v1621_v1 = vld [vmem:[%s404_s16 + $0x4] sm:$0xf]  ;;  %p412_p9 = scmp.lt.s32.totalorder %s1310_s22, 3  ;;  %s1805_s21 = smov (!%p381_p8, %s1303_s21), 0 }
  0x16   : > { %437 = vrot.lane.b32.xlu0 %v1617_v0, %s1527_s20  ;;  %s1304_s23 = sshll.u32 %s1805_s21, 1  ;;  %s1528_s18 = smov (!%p1316_p11), 8  }
  0x17   : > { %s1807_s22 = smov (!%p412_p9, %s1310_s22), 3  ;;  %p386_p10 = scmp.lt.s32.totalorder %s1304_s23, 3 }
  0x18   : > { %s415_s25 = sadd.s32 %s1305_s10, %s1807_s22 }
  0x19   : > { %s1312_s8 = sshll.u32 %s415_s25, 2  ;;  %s1809_s23 = smov (!%p386_p10, %s1304_s23), 3 }
  0x1a   : > { %439 = vrot.lane.b32.xlu0 %v1621_v1, %s1527_s20  ;;  %s1627_s13 = scalar_lea.vmem %s1776_s2, %s1312_s8  ;;  %s389_s14 = sadd.s32 %s1305_s10, %s1809_s23 }
  0x1b   : > { %s1306_s9 = sshll.u32 %s389_s14, 2  ;;  %v450_v4 = vld [vmem:[%s1627_s13] sm:$0x1] (!%p1316_p11) }
  0x1c   : > { %s1632_s17 = scalar_lea.vmem %s1774_s0, %s1306_s9 }
  0x1e   : > { %452 = vrot.lane.b32.xlu0 (!%p1316_p11), %v450_v4, %s1528_s18 }
  0x87   : > { %449 = sbr.rel (%p1316_p11) target bundleno = 146 (0x92), region = 52 }
  0x88   : > { %v438_v2 = vpop.permute.xlu0 %437 }
  0x89   : > { %444 = vst.msk [vmem:[#allocation2] sm:$0xf] %vm443_vm0, %v438_v2 }
  0x8c   : > { %v440_v3 = vpop.permute.xlu0 %439 }
  0x8d   : > { %445 = vst.msk [vmem:[#allocation2 + $0x4] sm:$0xf] %vm443_vm0, %v440_v3 }
  0x90   : > { %v453_v5 = vpop.permute.xlu0 %452 }
  0x91   : > { %456 = vst.msk [vmem:[#allocation2 + $0x8] sm:$0x1] %vm455_vm1, %v453_v5 }
  0x92 PF: > { %p1317_p12 = scmp.ne.s32.totalorder %s1509_s24, 1 }
  0x93   : > { %vm461_vm2 = vcmask (!%p1317_p12), 90176   ;;  %v1529_v6 = vmov (!%p1317_p12), 0  }
  0x94   : > { %460 = sbr.rel (%p1317_p12) target bundleno = 155 (0x9b), region = 56  ;;  %462 = vst.msk [vmem:[#allocation2 + $0x8] sm:$0x1] (!%p1317_p12), %vm461_vm2, %v1529_v6 }
  0x9b PF: > { %v463_v7 = vld [vmem:[%s1632_s17 + $0x4] sm:$0x8]  ;;  %v489_v8 = vshrl.u32 %v1621_v1, 16  ;;  %v481_v9 = vshrl.u32 %v1617_v0, 16  ;;  %v484_v10 = vshll.u32 %v1617_v0, 16  ;;  %v492_v14 = vshll.u32 %v1621_v1, 16 }
  0x9c   : > { %v465_v11 = vshrl.u32 %v463_v7, 16  ;;  %v517_v16 = vld [vmem:[%s1627_s13] sm:$0x1]  ;;  %vm473_vm3 = vsmask.f32 256  ;;  %s1530_s10 = smov 4  }
  0x9d   : > { %v491_v12 = vrot.slane %v489_v8, 7  ;;  %v483_v13 = vrot.slane %v481_v9, 7  ;;  %vm478_vm4 = vsmask.f32 4368  ;;  %v519_v20 = vshll.u32 %v517_v16, 16  ;;  %p1319_p13 = scmp.le.s32.totalorder %s1509_s24, 0 }
  0x9e   : > { %v1318_v15 = vrot.slane %v465_v11, 11  ;;  %vm479_vm5 = vmor %vm473_vm3, %vm478_vm4  ;;  %vm472_vm6 = vcmask 57376   ;;  %v475_v23 = vld [vmem:[#allocation2] sm:$0x1]  ;;  %v514_v26 = vld [vmem:[#allocation2 + $0x8] sm:$0x1] }
  0x9f   : > { %v486_v17 = vor.u32 %v484_v10, %v483_v13  ;;  %v496_v18 = vrot.slane %v491_v12, 4  ;;  %v487_v19 = vrot.slane %v483_v13, 4  ;;  %v494_v21 = vor.u32 %v492_v14, %v491_v12  ;;  %vm474_vm7 = vmand %vm472_vm6, %vm473_vm3  ;;  %v532_v36 = vld [vmem:[%s1632_s17 + $0x4] sm:$0x8] (!%p1319_p13) }
  0xa0   : > { %469 = vrot.lane.b32.xlu0 %v1318_v15, %s1530_s10  ;;  %vm507_vm8 = vsmask.f32 7938  ;;  %vm506_vm9 = vcmask 60448   ;;  %vm537_vm12 = vcmask (!%p1319_p13), 24576   ;;  %v1320_v37 = vrot.slane (!%p1319_p13), %v532_v36, 11 }
  0xa1   : > { %497 = vrot.lane.b32.xlu1 %v486_v17, %s1530_s10  ;;  %v495_v22 = vsel %vm479_vm5, %v487_v19, %v494_v21  ;;  %vm508_vm10 = vmand %vm506_vm9, %vm507_vm8 }
  0xa2   : > { %vm524_vm11 = vmand %vm472_vm6, %vm507_vm8 }
  0xa4   : > { %501 = vrot.lane.b32.xlu0 %v496_v18, %s1530_s10 }
  0xa5   : > { %521 = vrot.lane.b32.xlu1 %v519_v20, %s1530_s10 }
  0xa8   : > { %499 = vrot.lane.b32.xlu0 %v495_v22, %s1530_s10 }
 0x112   : > { %v470_v24 = vpop.permute.xlu0 %469 }
 0x113   : > { %v476_v25 = vsel %vm474_vm7, %v470_v24, %v475_v23  ;;  %v498_v29 = vpop.permute.xlu1 %497 }
 0x114   : > { %477 = vst [vmem:[#allocation2] sm:$0x1] %v476_v25 }
 0x116   : > { %v502_v27 = vpop.permute.xlu0 %501 }
 0x117   : > { %v515_v28 = vsel %vm474_vm7, %v502_v27, %v514_v26  ;;  %v522_v33 = vpop.permute.xlu1 %521 }
 0x118   : > { %516 = vst [vmem:[#allocation2 + $0x8] sm:$0x1] %v515_v28 }
 0x11a   : > { %v500_v30 = vpop.permute.xlu0 %499 }
 0x11b   : > { %v509_v31 = vld [vmem:[#allocation2] sm:$0xf]  ;;  %513 = vst.msk [vmem:[#allocation2 + $0x4] sm:$0xf] %vm506_vm9, %v500_v30  ;;  %531 = sbr.rel (%p1319_p13) target bundleno = 290 (0x122), region = 60 }
 0x11c   : > { %v510_v32 = vsel %vm508_vm10, %v498_v29, %v509_v31 }
 0x11d   : > { %511 = vst [vmem:[#allocation2] sm:$0xf] %v510_v32 }
 0x11e   : > { %538 = vst.msk [vmem:[#allocation2] sm:$0x1] (!%p1319_p13), %vm537_vm12, %v1320_v37 }
 0x11f   : > { %v525_v34 = vld [vmem:[#allocation2 + $0x8] sm:$0x1] }
 0x120   : > { %v526_v35 = vsel %vm524_vm11, %v522_v33, %v525_v34 }
 0x121   : > { %527 = vst [vmem:[#allocation2 + $0x8] sm:$0x1] %v526_v35 }
 0x122 PF: > { %p1321_p0 = scmp.ne.s32.totalorder %s1509_s24, 0 }
 0x123   : > { %vm543_vm13 = vcmask (!%p1321_p0), 24576   ;;  %v1531_v38 = vmov (!%p1321_p0), 0  }
 0x124   : > { %542 = sbr.rel (%p1321_p0) target bundleno = 299 (0x12b), region = 64  ;;  %544 = vst.msk [vmem:[#allocation2] sm:$0x1] (!%p1321_p0), %vm543_vm13, %v1531_v38 }
 0x12b PF: > { %v1475_v39 = vld [vmem:[%s1777_s3] sm:$0x3f]   ;;  %vm613_vm14 = vcmask 1045504   ;;  %vm545_vm15 = vcmask 1040384   ;;  %vm546_vm0 = vcmask 1044484   ;;  %v548_v40 = vrot.slane %v1617_v0, 7 }
 0x12c   : > { %1425 = vmatprep.subr.msk.bf16.mxu0 %vm613_vm14, %v1475_v39  ;;  %v615_v41 = vsel %vm613_vm14, %v1475_v39, 0  ;;  %vm547_vm1 = vmor %vm545_vm15, %vm546_vm0  ;;  %v550_v42 = vrot.slane %v1621_v1, 7  ;;  %vm556_vm2 = vcmask 27649   ;;  %vm558_vm3 = vcmask 27648   ;;  %v1478_v44 = vld [vmem:[%s1777_s3] sm:$0x3f]  }
 0x12d   : > { %1378 = vmatpush3.bf16.msra.mxu0 %v615_v41  ;;  %v549_v43 = vrot.slane %v548_v40, 4  ;;  %557 = vst.msk [vmem:[#allocation2] sm:$0xe] %vm556_vm2, %v548_v40  ;;  %vm560_vm4 = vcmask 24576   ;;  %s1532_s25 = smov 112   ;;  %vm606_vm5 = vcmask 97280   ;;  %v562_v54 = vlaneseq }
 0x12e   : > { %v552_v45 = vrot.slane %v550_v42, 4  ;;  %895 = vrot.lane.b32.xlu0 %v1478_v44, %s1532_s25  ;;  %v1324_v49 = vld [vmem:[%s1778_s4] ss:$0 sm:$0xff]  ;;  %v1533_v51 = vmov 0.0   ;;  %vm1534_vm6 = vmmov 0   ;;  %v1480_v52 = vld [vmem:[%s1779_s5 + $0x10] sm:$0xff]  }
 0x12f   : > { %v551_v46 = vsel %vm547_vm1, %v549_v43, %v550_v42  ;;  %v1479_v50 = vld [vmem:[%s1779_s5] sm:$0xff]   ;;  %1383 = vmatprep.subr.bf16.mxu1 %v1533_v51  ;;  %1389 = vmatprep.subr.bf16.mxu0 %v1533_v51  ;;  %s1322_s15 = sshll.u32 %s1509_s24, 4  ;;  %v563_v55 = vshrl.u32 %v562_v54, 7  ;;  %vm687_vm1 = vcmask 130048   ;;  %vm811_vm2 = vcmask 1046528   ;;  %v1484_v30 = vld [vmem:[%s1779_s5 + $0x8] sm:$0xff]  }
 0x130   : > { %559 = vst.msk [vmem:[#allocation2 + $0x4] sm:$0xf] %vm558_vm3, %v551_v46  ;;  %1384 = vmatpush3.bf16.msra.mxu1 %v1479_v50  ;;  %1385 = vmatprep.mubr.msk.bf16.mxu1 %vm1534_vm6, %v1533_v51  ;;  %s1323_s16 = sadd.s32 4294967295, %s1322_s15  ;;  %v1481_v15 = vld [vmem:[%s1779_s5 + $0x20] sm:$0xff]   ;;  %vm738_vm3 = vsmask.f32 7424 }
 0x131   : > { %561 = vst.msk [vmem:[#allocation2 + $0x8] sm:$0x1] %vm560_vm4, %v552_v45  ;;  %1395 = vmatprep.subr.bf16.mxu1 %v1533_v51  ;;  %v565_v56 = vadd.s32 16, %v563_v55  ;;  %v568_v57 = vstv %s1323_s16  ;;  %v564_v58 = vadd.s32 8, %v563_v55  ;;  %v1485_v31 = vld [vmem:[%s1779_s5 + $0x18] sm:$0xff]  }
 0x132   : > { %897 = vrot.lane.b32.xlu0 %v1324_v49, %s1532_s25  ;;  %v569_v60 = vadd.s32 %v568_v57, %v563_v55 }
 0x133   : > { %v571_v59 = vadd.s32 %v568_v57, %v565_v56  ;;  %v570_v61 = vadd.s32 %v568_v57, %v564_v58 }
 0x134   : > { %vm572_vm9 = vcmp.ge.s32.totalorder %v569_v60, 0  ;;  %vm575_vm10 = vcmp.lt.s32.totalorder %v569_v60, 32 }
 0x135   : > { %vm574_vm7 = vcmp.ge.s32.totalorder %v571_v59, 0  ;;  %vm577_vm8 = vcmp.lt.s32.totalorder %v571_v59, 32  ;;  %vm573_vm12 = vcmp.ge.s32.totalorder %v570_v61, 0  ;;  %vm576_vm13 = vcmp.lt.s32.totalorder %v570_v61, 32  ;;  %vm1684_vm15 = vmand %vm572_vm9, %vm575_vm10 }
 0x136   : > { %vm1680_vm11 = vmand %vm574_vm7, %vm577_vm8 }
 0x137   : > { %v1476_v47 = vld [vmem:[#allocation2] sm:$0xff]   ;;  %vm1690_vm0 = vmand %vm573_vm12, %vm576_vm13 }
 0x138   : > { %v1477_v48 = vld [vmem:[#allocation2 + $0x8] ss:$0 sps:$4 sm:$0x11]   ;;  %1379 = vmatprep.mubr.msk.bf16.mxu0 %vm606_vm5, %v1476_v47  ;;  %v1482_v27 = vld [vmem:[#allocation2] sm:$0xff]  }
 0x139   : > { %1380 = vmatmul.mubr.msk.bf16.vlgmr.msra.gmra.mrb[0].mxu0 %vm606_vm5, %v1477_v48  ;;  %v1483_v29 = vld [vmem:[#allocation2 + $0x8] ss:$0 sps:$4 sm:$0x11]  }
 0x13a   : > { %1391 = vmatprep.mubr.msk.bf16.mxu0 %vm1534_vm6, %v1533_v51  ;;  %1390 = vmatpush3.bf16.msra.mxu0 %v1480_v52 }
 0x1a0   : > { %v896_v53 = vpop.permute.xlu0 %895 }
 0x1a1   : > { %1426 = vmatprep.subr.msk.bf16.mxu0 %vm613_vm14, %v896_v53  ;;  %v907_v26 = vsel %vm613_vm14, %v896_v53, 0  ;;  %vm732_vm14 = vcmask 31744  }
 0x1a4   : > { %v898_v48 = vpop.permute.xlu0 %897 }
 0x20c   : > { %v1381_v62 = vpop.f32.mrb[0].mxu0 }
 0x20d   : > { %v660_v63 = vadd.f32 %v1381_v62, %v1324_v49  ;;  %v651_v0 = vpop.f32.mrb[1].mxu0 }
 0x20e   : > { %v652_v2 = vadd.f32 %v1324_v49, %v651_v0  ;;  %v1382_v3 = vpop.f32.mrb[2].mxu0 }
 0x20f   : > { %v667_v4 = vmax.f32 %v660_v63, 0.0  ;;  %v654_v5 = vpop.f32.mrb[3].mxu0 }
 0x210   : > { %v665_v7 = vmax.f32 %v652_v2, 0.0  ;;  %v655_v8 = vadd.f32 %v1324_v49, %v654_v5  ;;  %v1486_v5 = vld [vmem:[%s1779_s5 + $0x28] sm:$0xff]  }
 0x211   : > { %v676_v9 = vsel %vm1680_vm11, %v667_v4, 0.0 }
 0x212   : > { %v666_v11 = vmax.f32 %v655_v8, 0.0  ;;  %v678_v12 = vpack.c.bf16 %v676_v9, %v676_v9  ;;  %v674_v13 = vsel %vm1684_vm15, %v665_v7, 0.0 }
 0x214   : > { %v675_v14 = vsel %vm1690_vm0, %v666_v11, 0.0  ;;  %v746_v17 = vshll.u32 %v678_v12, 16  ;;  %v813_v18 = vrot.slane %v678_v12, 1 }
 0x215   : > { %v677_v16 = vpack.c.bf16 %v675_v14, %v674_v13 }
 0x216   : > { %v748_v24 = vrot.slane %v746_v17, 1 }
 0x217   : > { %v741_v19 = vshll.u32 %v677_v16, 16  ;;  %1386 = vmatmul.mubr.msk.bf16.vlgmr.msra.gmra.mrb[0].mxu1 %vm687_vm1, %v677_v16  ;;  %v812_v20 = vrot.slane %v677_v16, 1  ;;  %v739_v21 = vshrl.u32 %v677_v16, 16 }
 0x218   : > { %1396 = vmatpush3.bf16.msra.mxu1 %v1481_v15  ;;  %1397 = vmatprep.mubr.msk.bf16.mxu1 %vm1534_vm6, %v1533_v51 }
 0x219   : > { %v743_v22 = vrot.slane %v741_v19, 1  ;;  %v814_v23 = vsel %vm811_vm2, %v812_v20, %v813_v18  ;;  %1407 = vmatprep.subr.bf16.mxu1 %v1533_v51 }
 0x21b   : > { %v744_v25 = vor.u32 %v743_v22, %v739_v21 }
 0x21d   : > { %v749_v28 = vsel %vm738_vm3, %v744_v25, %v748_v24 }
 0x21e   : > { %1392 = vmatmul.mubr.msk.bf16.vlgmr.msra.gmra.mrb[4].mxu0 %vm687_vm1, %v749_v28 }
 0x21f   : > { %1402 = vmatpush3.bf16.msra.mxu0 %v907_v26  ;;  %1398 = vmatmul.mubr.msk.bf16.vlgmr.msra.gmra.mrb[4].mxu1 %vm687_vm1, %v814_v23 }
 0x220   : > { %1403 = vmatprep.mubr.msk.bf16.mxu0 %vm606_vm5, %v1482_v27  ;;  %1409 = vmatprep.mubr.msk.bf16.mxu1 %vm1534_vm6, %v1533_v51 }
 0x221   : > { %1413 = vmatprep.subr.bf16.mxu0 %v1533_v51  ;;  %1408 = vmatpush3.bf16.msra.mxu1 %v1484_v30 }
 0x222   : > { %1419 = vmatprep.subr.bf16.mxu1 %v1533_v51 }
 0x226   : > { %1404 = vmatmul.mubr.msk.bf16.vlgmr.msra.gmra.mrb[8].mxu0 %vm606_vm5, %v1483_v29 }
 0x227   : > { %1415 = vmatprep.mubr.msk.bf16.mxu0 %vm1534_vm6, %v1533_v51  ;;  %1414 = vmatpush3.bf16.msra.mxu0 %v1485_v31 }
 0x2ea   : > { %v725_v32 = vpop.f32.mrb[0].mxu1 }
 0x2eb   : > { %733 = vst.msk [vmem:[#allocation3] sm:$0xff] %vm732_vm14, %v725_v32  ;;  %v1387_v33 = vpop.f32.mrb[1].mxu1 }
 0x2ec   : > { %v728_v34 = vpop.f32.mrb[2].mxu1 }
 0x2ed   : > { %734 = vst.msk [vmem:[#allocation3 + $0x8] sm:$0xff] %vm732_vm14, %v728_v34  ;;  %v1388_v35 = vpop.f32.mrb[3].mxu1 }
 0x2f1   : > { %v793_v36 = vpop.f32.mrb[4].mxu0 }
 0x2f2   : > { %v800_v37 = vld [vmem:[#allocation3] sm:$0xff]  ;;  %v1393_v38 = vpop.f32.mrb[5].mxu0  ;;  %v858_v39 = vpop.f32.mrb[4].mxu1 }
 0x2f3   : > { %v802_v40 = vadd.f32 %v800_v37, %v793_v36  ;;  %v796_v41 = vpop.f32.mrb[6].mxu0  ;;  %v1399_v42 = vpop.f32.mrb[5].mxu1 }
 0x2f4   : > { %v801_v43 = vld [vmem:[#allocation3 + $0x8] sm:$0xff]  ;;  %v1394_v44 = vpop.f32.mrb[7].mxu0  ;;  %v861_v45 = vpop.f32.mrb[6].mxu1 }
 0x2f5   : > { %804 = vst.msk [vmem:[#allocation3] sm:$0xff] %vm732_vm14, %v802_v40  ;;  %v803_v46 = vadd.f32 %v801_v43, %v796_v41  ;;  %v1400_v47 = vpop.f32.mrb[7].mxu1 }
 0x2f7   : > { %805 = vst.msk [vmem:[#allocation3 + $0x8] sm:$0xff] %vm732_vm14, %v803_v46 }
 0x2f9   : > { %v1405_v49 = vpop.f32.mrb[8].mxu0 }
 0x2fa   : > { %v952_v50 = vadd.f32 %v1405_v49, %v898_v48  ;;  %v943_v52 = vpop.f32.mrb[9].mxu0 }
 0x2fb   : > { %v944_v53 = vadd.f32 %v943_v52, %v898_v48  ;;  %v1406_v54 = vpop.f32.mrb[10].mxu0 }
 0x2fc   : > { %v865_v55 = vld [vmem:[#allocation3] sm:$0xff]  ;;  %v959_v56 = vmax.f32 %v952_v50, 0.0  ;;  %v946_v57 = vpop.f32.mrb[11].mxu0 }
 0x2fd   : > { %v867_v58 = vadd.f32 %v865_v55, %v858_v39  ;;  %v957_v59 = vmax.f32 %v944_v53, 0.0  ;;  %v947_v60 = vadd.f32 %v946_v57, %v898_v48  ;;  %v1356_v39 = vld [vmem:[%s1780_s6] ss:$0 sm:$0xff] }
 0x2fe   : > { %v866_v61 = vld [vmem:[#allocation3 + $0x8] sm:$0xff]  ;;  %v962_v62 = vsel %vm1680_vm11, %v959_v56, 0.0 }
 0x2ff   : > { %869 = vst.msk [vmem:[#allocation3] sm:$0xff] %vm732_vm14, %v867_v58  ;;  %v868_v63 = vadd.f32 %v866_v61, %v861_v45  ;;  %v958_v0 = vmax.f32 %v947_v60, 0.0  ;;  %v964_v2 = vpack.c.bf16 %v962_v62, %v962_v62  ;;  %v960_v3 = vsel %vm1684_vm15, %v957_v59, 0.0 }
 0x301   : > { %870 = vst.msk [vmem:[#allocation3 + $0x8] sm:$0xff] %vm732_vm14, %v868_v63  ;;  %v961_v4 = vsel %vm1690_vm0, %v958_v0, 0.0  ;;  %v1032_v1 = vshll.u32 %v964_v2, 16  ;;  %v1097_v8 = vrot.slane %v964_v2, 1 }
 0x302   : > { %v963_v7 = vpack.c.bf16 %v961_v4, %v960_v3 }
 0x303   : > { %v1034_v13 = vrot.slane %v1032_v1, 1 }
 0x304   : > { %v1027_v9 = vshll.u32 %v963_v7, 16  ;;  %1410 = vmatmul.mubr.msk.bf16.vlgmr.msra.gmra.mrb[8].mxu1 %vm687_vm1, %v963_v7  ;;  %v1096_v11 = vrot.slane %v963_v7, 1  ;;  %v1025_v6 = vshrl.u32 %v963_v7, 16 }
 0x305   : > { %1420 = vmatpush3.bf16.msra.mxu1 %v1486_v5  ;;  %1421 = vmatprep.mubr.msk.bf16.mxu1 %vm1534_vm6, %v1533_v51 }
 0x306   : > { %v1029_v12 = vrot.slane %v1027_v9, 1  ;;  %v1098_v10 = vsel %vm811_vm2, %v1096_v11, %v1097_v8  ;;  %v1017_v17 = vld [vmem:[#allocation3] sm:$0xff] }
 0x308   : > { %v1030_v14 = vor.u32 %v1029_v12, %v1025_v6  ;;  %v1018_v21 = vld [vmem:[#allocation3 + $0x8] sm:$0xff] }
 0x30a   : > { %v1035_v15 = vsel %vm738_vm3, %v1030_v14, %v1034_v13 }
 0x30b   : > { %1416 = vmatmul.mubr.msk.bf16.vlgmr.msra.gmra.mrb[12].mxu0 %vm687_vm1, %v1035_v15 }
 0x30c   : > { %1422 = vmatmul.mubr.msk.bf16.vlgmr.msra.gmra.mrb[12].mxu1 %vm687_vm1, %v1098_v10 }
 0x3d7   : > { %v1010_v16 = vpop.f32.mrb[8].mxu1 }
 0x3d8   : > { %v1019_v18 = vadd.f32 %v1017_v17, %v1010_v16  ;;  %v1411_v19 = vpop.f32.mrb[9].mxu1 }
 0x3d9   : > { %v1013_v20 = vpop.f32.mrb[10].mxu1 }
 0x3da   : > { %1021 = vst.msk [vmem:[#allocation3] sm:$0xff] %vm732_vm14, %v1019_v18  ;;  %v1020_v51 = vadd.f32 %v1018_v21, %v1013_v20  ;;  %v1412_v22 = vpop.f32.mrb[11].mxu1 }
 0x3dc   : > { %1022 = vst.msk [vmem:[#allocation3 + $0x8] sm:$0xff] %vm732_vm14, %v1020_v51 }
 0x3de   : > { %v1079_v23 = vpop.f32.mrb[12].mxu0 }
 0x3df   : > { %v1417_v24 = vpop.f32.mrb[13].mxu0  ;;  %v1142_v25 = vpop.f32.mrb[12].mxu1 }
 0x3e0   : > { %v1082_v26 = vpop.f32.mrb[14].mxu0  ;;  %v1423_v27 = vpop.f32.mrb[13].mxu1 }
 0x3e1   : > { %v1086_v28 = vld [vmem:[#allocation3] sm:$0xff]  ;;  %v1418_v29 = vpop.f32.mrb[15].mxu0  ;;  %v1145_v30 = vpop.f32.mrb[14].mxu1 }
 0x3e2   : > { %v1088_v31 = vadd.f32 %v1086_v28, %v1079_v23  ;;  %v1424_v32 = vpop.f32.mrb[15].mxu1 }
 0x3e3   : > { %v1087_v33 = vld [vmem:[#allocation3 + $0x8] sm:$0xff] }
 0x3e4   : > { %1090 = vst.msk [vmem:[#allocation3] sm:$0xff] %vm732_vm14, %v1088_v31  ;;  %v1089_v34 = vadd.f32 %v1087_v33, %v1082_v26 }
 0x3e6   : > { %1091 = vst.msk [vmem:[#allocation3 + $0x8] sm:$0xff] %vm732_vm14, %v1089_v34 }
 0x3eb   : > { %v1149_v35 = vld [vmem:[#allocation3] sm:$0xff] }
 0x3ec   : > { %v1151_v36 = vadd.f32 %v1149_v35, %v1142_v25 }
 0x3ed   : > { %v1150_v37 = vld [vmem:[#allocation3 + $0x8] sm:$0xff] }
 0x3ee   : > { %1153 = vst.msk [vmem:[#allocation3] sm:$0xff] %vm732_vm14, %v1151_v36  ;;  %v1152_v38 = vadd.f32 %v1150_v37, %v1145_v30 }
 0x3f0   : > { %1154 = vst.msk [vmem:[#allocation3 + $0x8] sm:$0xff] %vm732_vm14, %v1152_v38 }
 0x3f5   : > { %v1155_v40 = vld [vmem:[#allocation3] sm:$0xff] }
 0x3f6   : > { %v1164_v41 = vadd.f32 %v1356_v39, %v1155_v40 }
 0x3f7   : > { %v1156_v42 = vld [vmem:[#allocation3 + $0x8] sm:$0xff] }
 0x3f8   : > { %v1166_v43 = vmax.f32 %v1164_v41, 0.0  ;;  %v1165_v44 = vadd.f32 %v1356_v39, %v1156_v42 }
 0x3fa   : > { %1168 = vst.msk [vmem:[%s1615_s19] sm:$0xff] %vm732_vm14, %v1166_v43  ;;  %v1167_v45 = vmax.f32 %v1165_v44, 0.0 }
 0x3fc   : > { %1169 = vst.msk [vmem:[%s1615_s19 + $0x8] sm:$0xff] %vm732_vm14, %v1167_v45 }
 0x3fd PF: > { %s17_s28 = sadd.s32 1, %s1525_s28   ;;  %s1788_s24 = smov %s1517_s26 }
 0x3fe   : > { %p14_p1 = scmp.ge.s32.totalorder %s17_s28, 6   ;;  %s1789_s25 = smov %s1521_s27 }
 0x3ff   : > { %s1790_s26 = smov %s1793_s29  ;;  %s1791_s27 = smov %s1797_s30 }
 0x400   :  { %16 = sbr.rel (!%p14_p1) target bundleno = 3 (0x3), region = 102 }

</bundles_post_ra>
